<compile_context>
chip_gen: v6e
topology: v6e:2x2x1
jax: 0.10.0
libtpu: 0.0.40
codegen_flags: <defaults>
</compile_context>

<pallas_src>
import functools

import jax
import jax.numpy as jnp
from jax.experimental import pallas as pl
from jax.experimental.pallas import tpu as pltpu


def _round_up(v, m):
    return ((v + m - 1) // m) * m


def _round_down(v, m):
    return (v // m) * m


def _classifier_kernel(x_ref, w_ref, bias_ref, o_ref, *, eps):
    # ---- LayerNorm statistics in f32, two-pass (torch default eps=1e-5) ----
    x = x_ref[...].astype(jnp.float32)                    # [TB, C]
    mean = jnp.mean(x, axis=-1, keepdims=True)
    xc = x - mean
    var = jnp.mean(xc * xc, axis=-1, keepdims=True)
    xn = xc * jax.lax.rsqrt(var + eps)                    # [TB, C]

    # ---- Stacked class heads; LN affine already folded into W'/b' by wrapper ----
    # (f32 MXU accumulate; operands in the weight compute dtype, bf16 fast path.)
    logits = jnp.dot(xn.astype(w_ref.dtype), w_ref[...],
                     preferred_element_type=jnp.float32)  # [TB, TN]
    o_ref[...] = (logits + bias_ref[...].astype(jnp.float32)).astype(o_ref.dtype)
    # NOTE: for very small N and large C one could instead normalize *after*
    # the matmul (apply mean/rsqrt correction on the [TB,TN] slab); not needed
    # here since the kernel is HBM-bound on the x stream.


def expandable_classifier_forward(x, gamma, beta, w, bias, *,
                                  compute_dtype=jnp.bfloat16, eps=1e-5):
    """
    x:     [B, C]   CLS-token activations
    gamma: [C]      LayerNorm weight
    beta:  [C]      LayerNorm bias
    w:     [C, N]   stacked per-class Linear weights (head i's weight row = column i)
    bias:  [N]      stacked per-class Linear biases
    returns logits [B, N] (float32)
    """
    B, C = x.shape
    N = w.shape[1]
    assert jnp.issubdtype(w.dtype, jnp.floating), "quantized W not supported here"
    assert jnp.issubdtype(jnp.dtype(compute_dtype), jnp.floating)

    # ---- fold the LayerNorm affine into the classifier weights (cheap, wrapper-side) ----
    w32 = w.astype(jnp.float32)
    w_fold = (gamma.astype(jnp.float32)[:, None] * w32).astype(compute_dtype)   # [C, N]
    bias_fold = beta.astype(jnp.float32) @ w32 + bias.astype(jnp.float32)       # [N]

    # ---- generation-aware VMEM budget (leave headroom for compiler scratch) ----
    try:
        vmem_physical = int(pltpu.get_tpu_info().vmem_capacity_bytes)
    except Exception:
        vmem_physical = 64 << 20            # conservative: v7x per-TC VMEM
    vmem_budget = int(0.78 * vmem_physical)  # ~100 MiB on v5e/v6e, ~50 MiB on v7x

    x_item = jnp.dtype(x.dtype).itemsize
    w_item = jnp.dtype(compute_dtype).itemsize
    out_item = 4                             # float32 logits

    # ---- class-dim tile: keep W' fully VMEM-resident unless it blows the budget ----
    # (Pallas double-buffers every BlockSpec input, constants included -> factor 2.)
    n_want = _round_up(N, 128)
    tn_cap = max(128, _round_down((vmem_budget // 2) // max(1, 2 * C * w_item), 128))
    TN = min(n_want, tn_cap)
    N_pad = _round_up(N, TN)

    # ---- batch tile: as large as the remaining budget allows (targets 512-1024 rows),
    #      no x padding, at least two grid steps for the v7x megacore when possible ----
    fixed = 2 * C * TN * w_item + 2 * 8 * TN * out_item        # resident W' + bias'
    per_row = 2 * C * x_item + 2 * TN * out_item               # x tile + out tile
    tb_budget = max(8, _round_down(max(0, vmem_budget - fixed) // per_row, 8))
    if B < 8:
        TB = B                                                 # full-dim block
    else:
        TB = max(8, min(1024, _round_down(B, 8), tb_budget))
        if pl.cdiv(B, TB) == 1 and B >= 16:
            TB = max(8, _round_up(pl.cdiv(B, 2), 8))           # 2 parallel batch steps
    grid = (pl.cdiv(B, TB), N_pad // TN)

    w_p = jnp.pad(w_fold, ((0, 0), (0, N_pad - N)))            # zero cols -> zero logits
    bias_p = jnp.pad(bias_fold, (0, N_pad - N)).reshape(1, N_pad)

    cost = pl.CostEstimate(
        flops=2 * B * C * N_pad + 7 * B * C,
        transcendentals=B,
        bytes_accessed=(B * C * x_item + C * N_pad * w_item
                        + B * N_pad * out_item + N_pad * 4),
    )

    out = pl.pallas_call(
        functools.partial(_classifier_kernel, eps=eps),
        out_shape=jax.ShapeDtypeStruct((B, N_pad), jnp.float32),
        grid=grid,
        in_specs=[
            pl.BlockSpec((TB, C), lambda i, j: (i, 0)),    # x: batch-tiled, held across N tiles
            pl.BlockSpec((C, TN), lambda i, j: (0, j)),    # W': resident when TN == N_pad
            pl.BlockSpec((1, TN), lambda i, j: (0, j)),    # bias'
        ],
        out_specs=pl.BlockSpec((TB, TN), lambda i, j: (i, j)),
        compiler_params=pltpu.CompilerParams(
            dimension_semantics=("parallel", "parallel"),
            vmem_limit_bytes=vmem_budget,
        ),
        cost_estimate=cost,
    )(x, w_p, bias_p)

    return out[:, :N]


def _reference(x, gamma, beta, w, bias):
    mean = jnp.mean(x, axis=-1, keepdims=True)
    var = jnp.mean((x - mean) ** 2, axis=-1, keepdims=True)
    xn = (x - mean) / jnp.sqrt(var + 1e-5)
    y = xn * gamma + beta
    return y @ w + bias


if __name__ == "__main__":
    B = 2            # batch (CLS tokens)
    hidden_dim = 32  # hidden size
    num_classes = 8  # classes set via set_initial_task

    key = jax.random.PRNGKey(0)
    kx, kg, kb, kw, kbias = jax.random.split(key, 5)

    x = jax.random.normal(kx, (B, hidden_dim), dtype=jnp.float32)

    # LayerNorm affine + stacked Linear(hidden, 1) heads.
    gamma = jnp.ones((hidden_dim,), jnp.float32) + 0.01 * jax.random.normal(kg, (hidden_dim,))
    beta = 0.01 * jax.random.normal(kb, (hidden_dim,))
    # Each head i: weight [1, hidden], bias [1]; stacked -> W [hidden, N], b [N]
    w = 0.1 * jax.random.normal(kw, (hidden_dim, num_classes), dtype=jnp.float32)
    bias = 0.1 * jax.random.normal(kbias, (num_classes,), dtype=jnp.float32)

    ref = _reference(x, gamma, beta, w, bias)

    # f32 compute path (tight correctness check).
    logits_f32 = expandable_classifier_forward(x, gamma, beta, w, bias,
                                               compute_dtype=jnp.float32)
    jax.block_until_ready(logits_f32)
    assert logits_f32.shape == (B, num_classes)
    assert jnp.allclose(logits_f32, ref, atol=5e-3, rtol=5e-3), "f32 path mismatch"

    # Default bf16-weight fast path (f32 LN stats + f32 MXU accumulate).
    logits = expandable_classifier_forward(x, gamma, beta, w, bias)
    jax.block_until_ready(logits)
    assert logits.shape == (B, num_classes)
    assert jnp.allclose(logits, ref, atol=3e-2, rtol=3e-2), "bf16 path mismatch"

    print("KERNEL_OK")
</pallas_src>

<mosaic_0001>
module attributes {stable_mosaic.version = 11 : i64} {
  func.func @_classifier_kernel(%arg0: i32, %arg1: i32, %arg2: memref<2x32xf32, #tpu.memory_space<vmem>>, %arg3: memref<32x128xf32, #tpu.memory_space<vmem>>, %arg4: memref<1x128xf32, #tpu.memory_space<vmem>>, %arg5: memref<2x128xf32, #tpu.memory_space<vmem>>) attributes {dimension_semantics = [#tpu.dimension_semantics<parallel>, #tpu.dimension_semantics<parallel>], iteration_bounds = array<i64: 1, 1>, scalar_prefetch = 0 : i64, scratch_operands = 0 : i64, tpu.core_type = #tpu.core_type<tc>, window_params = [{transform_indices = @transform_0, window_bounds = array<i64: 2, 32>}, {transform_indices = @transform_1, window_bounds = array<i64: 32, 128>}, {transform_indices = @transform_2, window_bounds = array<i64: 1, 128>}, {transform_indices = @transform_3, window_bounds = array<i64: 2, 128>}]} {
    %c0 = arith.constant 0 : index
    %c0_0 = arith.constant 0 : index
    %0 = vector.load %arg2[%c0, %c0_0] : memref<2x32xf32, #tpu.memory_space<vmem>>, vector<2x32xf32>
    %cst = arith.constant dense<0.000000e+00> : vector<2xf32>
    %1 = vector.multi_reduction <add>, %0, %cst [1] : vector<2x32xf32> to vector<2xf32>
    %2 = vector.shape_cast %1 : vector<2xf32> to vector<2x1xf32>
    %cst_1 = arith.constant 3.200000e+01 : f32
    %3 = vector.broadcast %cst_1 : f32 to vector<2x1xf32>
    %4 = arith.divf %2, %3 : vector<2x1xf32>
    %5 = vector.broadcast %4 : vector<2x1xf32> to vector<2x32xf32>
    %6 = arith.subf %0, %5 : vector<2x32xf32>
    %7 = arith.mulf %6, %6 : vector<2x32xf32>
    %cst_2 = arith.constant dense<0.000000e+00> : vector<2xf32>
    %8 = vector.multi_reduction <add>, %7, %cst_2 [1] : vector<2x32xf32> to vector<2xf32>
    %9 = vector.shape_cast %8 : vector<2xf32> to vector<2x1xf32>
    %cst_3 = arith.constant 3.200000e+01 : f32
    %10 = vector.broadcast %cst_3 : f32 to vector<2x1xf32>
    %11 = arith.divf %9, %10 : vector<2x1xf32>
    %cst_4 = arith.constant 9.99999974E-6 : f32
    %12 = vector.broadcast %cst_4 : f32 to vector<2x1xf32>
    %13 = arith.addf %11, %12 : vector<2x1xf32>
    %14 = math.rsqrt %13 : vector<2x1xf32>
    %15 = vector.broadcast %14 : vector<2x1xf32> to vector<2x32xf32>
    %16 = arith.mulf %6, %15 : vector<2x32xf32>
    %c0_5 = arith.constant 0 : index
    %c0_6 = arith.constant 0 : index
    %17 = vector.load %arg3[%c0_5, %c0_6] : memref<32x128xf32, #tpu.memory_space<vmem>>, vector<32x128xf32>
    %cst_7 = arith.constant dense<0.000000e+00> : vector<2x128xf32>
    %18 = tpu.matmul %16, %17, %cst_7 {dimension_numbers = #tpu.dot_dimension_numbers<[1], [0], [0], [1], [0, 0, 1, 1], [], []>} : vector<2x32xf32>, vector<32x128xf32>, vector<2x128xf32> -> vector<2x128xf32>
    %c0_8 = arith.constant 0 : index
    %c0_9 = arith.constant 0 : index
    %19 = vector.load %arg4[%c0_8, %c0_9] : memref<1x128xf32, #tpu.memory_space<vmem>>, vector<1x128xf32>
    %20 = vector.broadcast %19 : vector<1x128xf32> to vector<2x128xf32>
    %21 = arith.addf %18, %20 : vector<2x128xf32>
    %c0_10 = arith.constant 0 : index
    %c0_11 = arith.constant 0 : index
    %22 = vector.load %arg5[%c0_10, %c0_11] : memref<2x128xf32, #tpu.memory_space<vmem>>, vector<2x128xf32>
    tpu.vector_store %arg5[%c0_10, %c0_11], %21 {strides = array<i32>} : memref<2x128xf32, #tpu.memory_space<vmem>>, vector<2x128xf32>,
    return
  }
  func.func @transform_0(%arg0: i32, %arg1: i32) -> (i32, i32) {
    %c0_i32 = arith.constant 0 : i32
    %c0_i32_0 = arith.constant 0 : i32
    return %arg0, %c0_i32 : i32, i32
  }
  func.func @transform_1(%arg0: i32, %arg1: i32) -> (i32, i32) {
    %c0_i32 = arith.constant 0 : i32
    %c0_i32_0 = arith.constant 0 : i32
    return %c0_i32, %arg1 : i32, i32
  }
  func.func @transform_2(%arg0: i32, %arg1: i32) -> (i32, i32) {
    %c0_i32 = arith.constant 0 : i32
    %c0_i32_0 = arith.constant 0 : i32
    return %c0_i32, %arg1 : i32, i32
  }
  func.func @transform_3(%arg0: i32, %arg1: i32) -> (i32, i32) {
    %c0_i32 = arith.constant 0 : i32
    return %arg0, %arg1 : i32, i32
  }
}

</mosaic_0001>

<bundles_post_ra>
// kernel: tpu_custom_call.1
= control target key start
LH: loop header
LB: loop body
LE: loop exit
PB: predicated region body
PF: predicated region fallthrough
CT: control target
= control target key end

     0   :  { %8 = vsyncpa [#allocation3], 0  ;;  %s291_s0 = inlined_call_operand.hbm [shape: f32[2,32], index: 0, kind: input, shape index: {}]   ;;  %s292_s1 = inlined_call_operand.hbm [shape: f32[32,128], index: 1, kind: input, shape index: {}]   ;;  %s293_s2 = inlined_call_operand.vmem [shape: f32[1,128], index: 2, kind: input, shape index: {}]   ;;  %s294_s3 = inlined_call_operand.hbm [shape: f32[2,128], index: 3, kind: output, shape index: {}]  }
   0x1   :  { %9 = vsyncpa [#allocation6], 0 }
   0x2   :  { %10 = vsyncpa [#allocation4], 0  ;;  %s252_s12 = smov [#allocation2]   ;;  %s253_s14 = smov [#allocation5]  }
   0x3   :  { %s17_s13 = sshll.u32 %s252_s12, 4  ;;  %s26_s15 = sshll.u32 %s253_s14, 4  ;;  %s18_s13 = int_to_ptr.vmem [resolvable:$true] %s17_s13  ;;  %s27_s15 = int_to_ptr.vmem [resolvable:$true] %s26_s15 }
   0x4   :  { %s194_s16 = scalar_lea.vmem %s18_s13, 32  ;;  %p199_p1 = scmp.lt.s32.totalorder %s18_s13, %s18_s13 }
   0x5   :  { %p195_p0 = scmp.ne.s32.totalorder %s18_s13, %s194_s16  ;;  %p200_p2 = scmp.lt.s32.totalorder %s194_s16, %s194_s16 }
   0x7   :  { %p201_p3 = por %p200_p2, %p199_p1 }
   0x9   :  { %p202_p4 = pnand %p201_p3, %p195_p0 }
   0xb   :  { %205 = shalt.err (!%p202_p4)
}
   0xc   :  { %20 = dma.hbm_to_vmem [thread:$0]  %s291_s0, 32, %s18_s13, [#allocation3]  }
   0xd   :  { %s214_s19 = scalar_lea.vmem %s27_s15, 512  ;;  %p219_p6 = scmp.lt.s32.totalorder %s27_s15, %s27_s15 }
   0xe   :  { %p215_p5 = scmp.ne.s32.totalorder %s27_s15, %s214_s19  ;;  %p220_p7 = scmp.lt.s32.totalorder %s214_s19, %s214_s19 }
  0x10   :  { %p221_p8 = por %p220_p7, %p219_p6 }
  0x12   :  { %p222_p9 = pnand %p221_p8, %p215_p5 }
  0x14   :  { %225 = shalt.err (!%p222_p9)
}
  0x15   :  { %s254_s20 = smov 128   ;;  %s255_s21 = smov 8  }
  0x16   :  { %32 = dma.hbm_to_vmem [thread:$0]  %s292_s1, 512, %s27_s15, [#allocation6], %s254_s20, %s254_s20, %s255_s21  }
  0x17   :  { %246 = dma.done.wait [#allocation3], 32  }
  0x18   :  { %247 = vsyncadd [#allocation3], 4294967264 }
  0x19   :  { %248 = dma.done.wait [#allocation6], 512  }
  0x1a   :  { %249 = vsyncadd [#allocation6], 4294966784  ;;  %vm42_vm0 = vcmask 254976   ;;  %v41_v0 = vld [vmem:[#allocation2] sm:$0x3]  ;;  %v256_v8 = vmov 0.0  }
  0x1b   :  { %v43_v1 = vsel %vm42_vm0, %v41_v0, 0.0  ;;  %v60_v7 = vld [vmem:[#allocation5 + $0x18] sm:$0xff]  ;;  %166 = vmatprep.subr.mxu0 %v256_v8  ;;  %v59_v9 = vld [vmem:[#allocation5 + $0x10] sm:$0xff]  ;;  %vm257_vm1 = vmmov 0   ;;  %v58_v10 = vld [vmem:[#allocation5 + $0x8] sm:$0xff]  ;;  %vm68_vm2 = vcmask 261120  }
  0x1c   :  { %44 = vadd.xlane.f32.xlu0 %v43_v1  ;;  %174 = vmatprep.mubr.msk.f32.mxu0 %vm257_vm1, %v256_v8  ;;  %v57_v11 = vld [vmem:[#allocation5] sm:$0xff]  ;;  %v159_v17 = vld [vmem:[%s293_s2] ss:$0 sm:$0xff]  ;;  %s258_s24 = smov [#allocation7]  }
  0x1d   :  { %167 = vmatpush3.msra.mxu0 %v60_v7  ;;  %s149_s25 = sshll.u32 %s258_s24, 4  ;;  %s150_s25 = int_to_ptr.vmem [resolvable:$true] %s149_s25 }
  0x1e   :  { %168 = vmatprep.subr.mxu0 %v256_v8  ;;  %s226_s26 = scalar_lea.vmem %s150_s25, 32  ;;  %p231_p11 = scmp.lt.s32.totalorder %s150_s25, %s150_s25 }
  0x1f   :  { %169 = vmatpush3.msra.mxu0 %v59_v9  ;;  %p227_p10 = scmp.ne.s32.totalorder %s150_s25, %s226_s26  ;;  %p232_p12 = scmp.lt.s32.totalorder %s226_s26, %s226_s26 }
  0x20   :  { %170 = vmatprep.subr.mxu0 %v256_v8 }
  0x21   :  { %171 = vmatpush3.msra.mxu0 %v58_v10  ;;  %p233_p13 = por %p232_p12, %p231_p11 }
  0x22   :  { %172 = vmatprep.subr.mxu0 %v256_v8 }
  0x23   :  { %173 = vmatpush3.msra.mxu0 %v57_v11  ;;  %p234_p0 = pnand %p233_p13, %p227_p10 }
  0xa5   :  { %v45_v2 = vpop.xlane.xlu0 %44 }
  0xa6   :  { %v47_v3 = vmul.f32 0.03125, %v45_v2 }
  0xa8   :  { %v48_v4 = vsub.f32 %v41_v0, %v47_v3 }
  0xaa   :  { %v49_v5 = vmul.f32 %v48_v4, %v48_v4 }
  0xac   :  { %v50_v6 = vsel %vm42_vm0, %v49_v5, 0.0 }
  0xad   :  { %51 = vadd.xlane.f32.xlu0 %v50_v6 }
 0x136   :  { %v52_v12 = vpop.xlane.xlu0 %51 }
 0x137   :  { %v53_v13 = vmul.f32 0.03125, %v52_v12 }
 0x139   :  { %v54_v14 = vadd.f32 1e-05, %v53_v13 }
 0x13b   :  { %184 = vrsqrt.f32 %v54_v14 }
 0x148   :  { %v185_v15 = vpop.eup %184 }
 0x149   :  { %v56_v16 = vmul.f32 %v185_v15, %v48_v4 }
 0x14b   :  { %175 = vmatmul.mubr.msk.f32.vlgmr.msra.gmra.mxu0 %vm68_vm2, %v56_v16 }
 0x20b   :  { %v138_v18 = vpop.f32.mrf.mxu0 }
 0x20c   :  { %v139_v19 = vadd.f32 %v159_v17, %v138_v18 }
 0x20d   :  { %v176_v20 = vpop.f32.mrf.mxu0 }
 0x20e   :  { %142 = vst [vmem:[#allocation7] sm:$0x3] %v139_v19 }
 0x20f   :  { %237 = shalt.err (!%p234_p0)
}
 0x210   :  { %152 = dma.vmem_to_hbm [thread:$0]  %s150_s25, 32, %s294_s3, [#allocation4]  }
 0x211   :  { %250 = dma.done.wait [#allocation4], 32  }
 0x212   :  { %251 = vsyncadd [#allocation4], 4294967264 }
 0x213   :  { %156 = vsyncpa [#allocation3], 1 }
 0x214   :  { %157 = vsyncpa [#allocation6], 1 }
 0x215   :  { %158 = vsyncpa [#allocation4], 1 }

</bundles_post_ra>
